<compile_context>
chip_gen: v5e
topology: v5e:2x2
jax: 0.10.0
libtpu: 0.0.40
codegen_flags: <defaults>
</compile_context>

<pallas_src>
import functools

import jax
import jax.numpy as jnp
import numpy as np
from jax import lax
from jax.experimental import pallas as pl
from jax.experimental.pallas import tpu as pltpu

ALPHA = 0.25
GAMMA = 2.0
LANES = 128
CHUNK_ROWS = 512                 # fold granularity: keeps the live vreg set small
TARGET_STEP_BYTES = 8 << 20      # ~8 MiB of input per grid step (~16 MiB dbl-buffered)
MAX_BLOCK_ROWS = 16384           # cap even for narrow (bf16 / fp8) input dtypes


def _round_up(x, m):
    return ((x + m - 1) // m) * m


def _focal_loss_kernel(x_ref, t_ref, out_ref, *, alpha, gamma, block_rows,
                       chunk_rows, full_rows, rem_lanes, mask_mode):
    """mask_mode: 0 = never mask, 1 = mask only the last grid block, 2 = always mask."""
    nchunks = block_rows // chunk_rows

    def chunk_partial(c, apply_mask):
        if nchunks == 1:
            x = x_ref[...]
            t = t_ref[...]
            row0 = 0
        else:
            row0 = pl.multiple_of(c * chunk_rows, chunk_rows)
            x = x_ref[pl.ds(row0, chunk_rows), :]
            t = t_ref[pl.ds(row0, chunk_rows), :]
        x = x.astype(jnp.float32)
        t = t.astype(jnp.float32)
        # TODO(synk): binary targets assumed (matches the PyTorch alpha.gather on
        # long targets); soft labels would need pt = exp(-bce) and a lerp'd alpha.

        # Numerically stable BCE-with-logits (same formula PyTorch uses):
        #   bce = max(x, 0) - x*t + log1p(exp(-|x|))
        s = jnp.exp(-jnp.abs(x))                         # EUP; reused below
        bce = jnp.maximum(x, 0.0) - x * t + jnp.log1p(s)

        # pt = exp(-bce) == sigmoid(x*(2t-1)) for binary t; reuse exp(-|x|) so no
        # second exp.  Divide -> EUP reciprocal + VPU mul (frees VALU slots).
        pos = t > 0.5
        z_nonneg = (x >= 0.0) == pos
        pt = jnp.where(z_nonneg, 1.0, s) * pl.reciprocal(1.0 + s, approx=False)

        # at = alpha_table.gather(0, targets) with alpha_table = [alpha, 1-alpha]
        at = jnp.where(pos, 1.0 - alpha, alpha)

        omp = 1.0 - pt
        if float(gamma) == 2.0:
            focal = omp * omp                            # no float-exponent pow
        elif float(gamma) == int(gamma) and gamma >= 1:
            focal = omp
            for _ in range(int(gamma) - 1):
                focal = focal * omp
        else:
            focal = omp ** gamma                         # generic fallback
        f_loss = at * focal * bce

        if apply_mask:
            # Row/lane comparisons (no flattened int32 index -> no overflow).
            row = lax.broadcasted_iota(jnp.int32, (chunk_rows, LANES), 0)
            g_row = pl.program_id(0) * block_rows + row0 + row
            valid = g_row < full_rows
            if rem_lanes:
                lane = lax.broadcasted_iota(jnp.int32, (chunk_rows, LANES), 1)
                valid = valid | ((g_row == full_rows) & (lane < rem_lanes))
            f_loss = jnp.where(valid, f_loss, 0.0)

        # Fold the chunk to one (8,128) vreg of per-lane partials: pure VPU adds,
        # no cross-lane XLU reduce.
        return jnp.sum(f_loss.reshape(chunk_rows // 8, 8, LANES), axis=0)

    def block_sum(apply_mask):
        if nchunks == 1:
            return chunk_partial(0, apply_mask)
        # Chunked accumulation keeps the live set to a few vregs regardless of
        # block size (no multi-MiB f_loss temp materialized in VMEM).
        return lax.fori_loop(
            0, nchunks,
            lambda c, acc: acc + chunk_partial(c, apply_mask),
            jnp.zeros((8, LANES), jnp.float32))

    if mask_mode == 0:
        out_ref[...] = block_sum(False)
    elif mask_mode == 2:
        out_ref[...] = block_sum(True)
    else:
        last = pl.program_id(0) == pl.num_programs(0) - 1

        @pl.when(jnp.logical_not(last))
        def _():
            out_ref[...] = block_sum(False)

        @pl.when(last)
        def _():
            out_ref[...] = block_sum(True)


def focal_loss(inputs, targets, alpha=ALPHA, gamma=GAMMA):
    """Focal loss forward. inputs: logits (any float dtype), targets: binary {0,1}."""
    assert inputs.shape == targets.shape
    total = int(np.prod(inputs.shape))

    # Keep native dtypes end-to-end: ravel is a free reshape, casts happen
    # per-block inside the kernel (no extra full-HBM passes in the wrapper).
    flat_x = jnp.ravel(inputs)
    flat_t = jnp.ravel(targets)

    rows = -(-total // LANES)
    full_rows, rem_lanes = divmod(total, LANES)
    if rem_lanes:
        # TODO(synk): a ragged tail (<128 elems) costs one padded full copy here;
        # a kernel-prefix + XLA-tail split would avoid it if this path gets hot.
        pad = rows * LANES - total
        flat_x = jnp.pad(flat_x, (0, pad))
        flat_t = jnp.pad(flat_t, (0, pad))

    x2d = flat_x.reshape(rows, LANES)
    t2d = flat_t.reshape(rows, LANES)

    # Block sizing: ~8 MiB of input per grid step (double-buffered ~16 MiB),
    # derived from the actual input dtypes; safe on v5e/v6e (128 MiB VMEM) and
    # v7x (64 MiB per TC) with the explicit vmem limit below.
    bytes_per_row = LANES * (x2d.dtype.itemsize + t2d.dtype.itemsize)
    if rows <= CHUNK_ROWS:
        block_rows = _round_up(rows, 32)   # 32: safe sublane tile for any dtype
        chunk_rows = block_rows
    else:
        budget_rows = TARGET_STEP_BYTES // bytes_per_row
        block_rows = int(min(budget_rows, MAX_BLOCK_ROWS, _round_up(rows, CHUNK_ROWS)))
        block_rows = max(CHUNK_ROWS, (block_rows // CHUNK_ROWS) * CHUNK_ROWS)
        chunk_rows = CHUNK_ROWS

    num_blocks = -(-rows // block_rows)
    # The grid is not padded: the last block may run past `rows` (Pallas clamps
    # the DMA; garbage rows are zeroed in-kernel) and the last real row may be
    # ragged if total % 128 != 0.
    needs_mask = (rows % block_rows != 0) or (rem_lanes != 0)
    if not needs_mask:
        mask_mode = 0
    elif num_blocks == 1:
        mask_mode = 2
    else:
        mask_mode = 1

    kernel = functools.partial(
        _focal_loss_kernel,
        alpha=float(alpha), gamma=float(gamma),
        block_rows=block_rows, chunk_rows=chunk_rows,
        full_rows=full_rows, rem_lanes=rem_lanes, mask_mode=mask_mode)

    step_bytes = block_rows * bytes_per_row
    vmem_limit = int(min(64 << 20, max(16 << 20, 2 * step_bytes + (2 << 20))))

    partials = pl.pallas_call(
        kernel,
        out_shape=jax.ShapeDtypeStruct((num_blocks * 8, LANES), jnp.float32),
        grid_spec=pltpu.PrefetchScalarGridSpec(
            num_scalar_prefetch=0,
            grid=(num_blocks,),
            in_specs=[
                pl.BlockSpec((block_rows, LANES), lambda i: (i, 0)),
                pl.BlockSpec((block_rows, LANES), lambda i: (i, 0)),
            ],
            # Lane-dense (8,128) partial-sum tile per grid step -> unmasked vst.
            out_specs=pl.BlockSpec((8, LANES), lambda i: (i, 0)),
        ),
        compiler_params=pltpu.CompilerParams(
            dimension_semantics=("parallel",),   # shards across v7x's 2 TensorCores
            vmem_limit_bytes=vmem_limit,
        ),
    )(x2d, t2d)

    # Tiny final reduction + mean in plain XLA.
    return jnp.sum(partials) / total


def focal_loss_ref(inputs, targets, alpha=ALPHA, gamma=GAMMA):
    """Pure-JAX reference matching the PyTorch module (independent formulation)."""
    x = inputs.astype(jnp.float32)
    t = targets.astype(jnp.float32)
    bce = jnp.maximum(x, 0.0) - x * t + jnp.log1p(jnp.exp(-jnp.abs(x)))
    at = jnp.where(t > 0.5, 1.0 - alpha, alpha)
    pt = jnp.exp(-bce)
    return jnp.mean(at * (1.0 - pt) ** gamma * bce)


if __name__ == "__main__":
    key = jax.random.PRNGKey(0)
    k1, k2 = jax.random.split(key)

    # NCHW logits and binary targets, small shapes (matches the module usage).
    x = jax.random.normal(k1, (2, 4, 16, 16), dtype=jnp.float32)
    targets = jax.random.bernoulli(k2, p=0.3, shape=(2, 4, 16, 16)).astype(jnp.float32)

    loss = jax.block_until_ready(focal_loss(x, targets))
    ref = jax.block_until_ready(focal_loss_ref(x, targets))
    np.testing.assert_allclose(np.asarray(loss), np.asarray(ref), rtol=1e-5, atol=1e-6)

    print("KERNEL_OK")
</pallas_src>

<mosaic_0001>
module attributes {stable_mosaic.version = 11 : i64} {
  func.func @_focal_loss_kernel(%arg0: i32, %arg1: memref<32x128xf32, #tpu.memory_space<vmem>>, %arg2: memref<32x128xf32, #tpu.memory_space<vmem>>, %arg3: memref<8x128xf32, #tpu.memory_space<vmem>>) attributes {dimension_semantics = [#tpu.dimension_semantics<parallel>], iteration_bounds = array<i64: 1>, scalar_prefetch = 0 : i64, scratch_operands = 0 : i64, tpu.core_type = #tpu.core_type<tc>, window_params = [{transform_indices = @transform_0, window_bounds = array<i64: 32, 128>}, {transform_indices = @transform_1, window_bounds = array<i64: 32, 128>}, {transform_indices = @transform_2, window_bounds = array<i64: 8, 128>}]} {
    %c0 = arith.constant 0 : index
    %c0_0 = arith.constant 0 : index
    %0 = vector.load %arg1[%c0, %c0_0] : memref<32x128xf32, #tpu.memory_space<vmem>>, vector<32x128xf32>
    %c0_1 = arith.constant 0 : index
    %c0_2 = arith.constant 0 : index
    %1 = vector.load %arg2[%c0_1, %c0_2] : memref<32x128xf32, #tpu.memory_space<vmem>>, vector<32x128xf32>
    %2 = math.absf %0 : vector<32x128xf32>
    %cst = arith.constant 0.000000e+00 : f32
    %3 = vector.broadcast %cst : f32 to vector<32x128xf32>
    %4 = arith.subf %3, %2 : vector<32x128xf32>
    %5 = math.exp %4 : vector<32x128xf32>
    %cst_3 = arith.constant 0.000000e+00 : f32
    %6 = vector.broadcast %cst_3 : f32 to vector<32x128xf32>
    %7 = arith.maximumf %0, %6 : vector<32x128xf32>
    %8 = arith.mulf %0, %1 : vector<32x128xf32>
    %9 = arith.subf %7, %8 : vector<32x128xf32>
    %10 = math.log1p %5 : vector<32x128xf32>
    %11 = arith.addf %9, %10 : vector<32x128xf32>
    %cst_4 = arith.constant 5.000000e-01 : f32
    %12 = vector.broadcast %cst_4 : f32 to vector<32x128xf32>
    %13 = arith.cmpf ogt, %1, %12 : vector<32x128xf32>
    %cst_5 = arith.constant 0.000000e+00 : f32
    %14 = vector.broadcast %cst_5 : f32 to vector<32x128xf32>
    %15 = arith.cmpf oge, %0, %14 : vector<32x128xf32>
    %16 = arith.xori %15, %13 : vector<32x128xi1>
    %cst_6 = arith.constant dense<true> : vector<32x128xi1>
    %17 = arith.xori %16, %cst_6 : vector<32x128xi1>
    %cst_7 = arith.constant 1.000000e+00 : f32
    %18 = vector.broadcast %cst_7 : f32 to vector<32x128xf32>
    %19 = arith.select %17, %18, %5 : vector<32x128xi1>, vector<32x128xf32>
    %cst_8 = arith.constant 1.000000e+00 : f32
    %20 = vector.broadcast %cst_8 : f32 to vector<32x128xf32>
    %21 = arith.addf %20, %5 : vector<32x128xf32>
    %22 = tpu.reciprocal %21 : vector<32x128xf32> -> vector<32x128xf32>
    %23 = arith.mulf %19, %22 : vector<32x128xf32>
    %cst_9 = arith.constant 7.500000e-01 : f32
    %cst_10 = arith.constant 2.500000e-01 : f32
    %24 = vector.broadcast %cst_9 : f32 to vector<32x128xf32>
    %25 = vector.broadcast %cst_10 : f32 to vector<32x128xf32>
    %26 = arith.select %13, %24, %25 : vector<32x128xi1>, vector<32x128xf32>
    %cst_11 = arith.constant 1.000000e+00 : f32
    %27 = vector.broadcast %cst_11 : f32 to vector<32x128xf32>
    %28 = arith.subf %27, %23 : vector<32x128xf32>
    %29 = arith.mulf %28, %28 : vector<32x128xf32>
    %30 = arith.mulf %26, %29 : vector<32x128xf32>
    %31 = arith.mulf %30, %11 : vector<32x128xf32>
    %32 = tpu.iota {dimensions = array<i32: 0>} : vector<32x128xi32>
    %c32_i32 = arith.constant 32 : i32
    %33 = arith.muli %arg0, %c32_i32 : i32
    %c0_i32 = arith.constant 0 : i32
    %34 = arith.addi %33, %c0_i32 : i32
    %35 = vector.broadcast %34 : i32 to vector<32x128xi32>
    %36 = arith.addi %35, %32 : vector<32x128xi32>
    %c16_i32 = arith.constant 16 : i32
    %37 = vector.broadcast %c16_i32 : i32 to vector<32x128xi32>
    %38 = arith.cmpi slt, %36, %37 : vector<32x128xi32>
    %cst_12 = arith.constant 0.000000e+00 : f32
    %39 = vector.broadcast %cst_12 : f32 to vector<32x128xf32>
    %40 = arith.select %38, %31, %39 : vector<32x128xi1>, vector<32x128xf32>
    %41 = vector.shape_cast %40 : vector<32x128xf32> to vector<4x8x128xf32>
    %cst_13 = arith.constant dense<0.000000e+00> : vector<8x128xf32>
    %42 = vector.multi_reduction <add>, %41, %cst_13 [0] : vector<4x8x128xf32> to vector<8x128xf32>
    %c0_14 = arith.constant 0 : index
    %c0_15 = arith.constant 0 : index
    %43 = vector.load %arg3[%c0_14, %c0_15] : memref<8x128xf32, #tpu.memory_space<vmem>>, vector<8x128xf32>
    tpu.vector_store %arg3[%c0_14, %c0_15], %42 {strides = array<i32>} : memref<8x128xf32, #tpu.memory_space<vmem>>, vector<8x128xf32>,
    return
  }
  func.func @transform_0(%arg0: i32) -> (i32, i32) {
    %c0_i32 = arith.constant 0 : i32
    %c0_i32_0 = arith.constant 0 : i32
    return %arg0, %c0_i32 : i32, i32
  }
  func.func @transform_1(%arg0: i32) -> (i32, i32) {
    %c0_i32 = arith.constant 0 : i32
    %c0_i32_0 = arith.constant 0 : i32
    return %arg0, %c0_i32 : i32, i32
  }
  func.func @transform_2(%arg0: i32) -> (i32, i32) {
    %c0_i32 = arith.constant 0 : i32
    %c0_i32_0 = arith.constant 0 : i32
    return %arg0, %c0_i32 : i32, i32
  }
}

</mosaic_0001>

<bundles_post_ra>
// kernel: tpu_custom_call.1
= control target key start
LH: loop header
LB: loop body
LE: loop exit
PB: predicated region body
PF: predicated region fallthrough
CT: control target
= control target key end

     0   :  { %7 = vsyncpa [#allocation3], 0  ;;  %s469_s0 = inlined_call_operand.hbm [shape: f32[16,128], index: 0, kind: input, shape index: {}]   ;;  %s470_s1 = inlined_call_operand.hbm [shape: f32[16,128], index: 1, kind: input, shape index: {}]   ;;  %s471_s2 = inlined_call_operand.hbm [shape: f32[8,128], index: 2, kind: output, shape index: {}]  }
   0x1   :  { %8 = vsyncpa [#allocation6], 0 }
   0x2   :  { %9 = vsyncpa [#allocation4], 0 }
   0x3   :  { %13 = vsyncadd [#allocation3], 256  ;;  %s14_s11 = sshll.u32 %s469_s0, 4  ;;  %s362_s12 = smov [#allocation2]   ;;  %s15_s11 = int_to_ptr.hbm [resolvable:$true] %s14_s11 }
   0x4   :  { %s16_s13 = sshll.u32 %s362_s12, 4  ;;  %s363_s14 = smov 128   ;;  %s17_s13 = int_to_ptr.vmem [resolvable:$true] %s16_s13 }
   0x5   :  { %s364_s15 = smov 8  }
   0x6   :  { %22 = dma.hbm_to_vmem [thread:$0]  %s15_s11, 256, %s17_s13, [#allocation3], %s363_s14, %s363_s14, %s364_s15  }
   0x7   :  { %26 = vsyncadd [#allocation6], 256  ;;  %s27_s18 = sshll.u32 %s470_s1, 4  ;;  %s365_s19 = smov [#allocation5]   ;;  %s28_s18 = int_to_ptr.hbm [resolvable:$true] %s27_s18 }
   0x8   :  { %s29_s20 = sshll.u32 %s365_s19, 4  ;;  %s30_s20 = int_to_ptr.vmem [resolvable:$true] %s29_s20 }
   0x9   :  { %35 = dma.hbm_to_vmem [thread:$0]  %s28_s18, 256, %s30_s20, [#allocation6], %s363_s14, %s363_s14, %s364_s15  }
   0xa   :  { %356 = dma.done.wait [#allocation3], 512  }
   0xb   :  { %357 = vsyncadd [#allocation3], 4294966784 }
   0xc   :  { %358 = dma.done.wait [#allocation6], 512  }
   0xd   :  { %359 = vsyncadd [#allocation6], 4294966784  ;;  %v390_v0 = vld [vmem:[#allocation2] sm:$0xff]  ;;  %v392_v1 = vld [vmem:[#allocation2 + $0x8] sm:$0xff]  ;;  %vm366_vm7 = vmmov 1   ;;  %s368_s0 = smov [#allocation7]  }
   0xe   :  { %v52_v2 = vand.u32 2147483647, %v390_v0  ;;  %v53_v3 = vand.u32 2147483647, %v392_v1  ;;  %v402_v12 = vld [vmem:[#allocation5] sm:$0xff]  ;;  %v404_v13 = vld [vmem:[#allocation5 + $0x8] sm:$0xff] }
   0xf   :  { %vm120_vm0 = vcmp.gt.f32.partialorder %v402_v12, 0.5  ;;  %vm124_vm1 = vcmp.ge.f32.partialorder %v390_v0, 0.0  ;;  %vm121_vm2 = vcmp.gt.f32.partialorder %v404_v13, 0.5  ;;  %vm125_vm3 = vcmp.ge.f32.partialorder %v392_v1, 0.0  ;;  %s252_s1 = sshll.u32 %s368_s0, 4  ;;  %s254_s23 = sshll.u32 %s471_s2, 4  ;;  %s253_s1 = int_to_ptr.vmem [resolvable:$true] %s252_s1  ;;  %s255_s23 = int_to_ptr.hbm [resolvable:$true] %s254_s23 }
  0x10   :  { %v56_v4 = vsub.f32 0.0, %v52_v2  ;;  %v57_v5 = vsub.f32 0.0, %v53_v3  ;;  %v68_v16 = vmax.f32 %v390_v0, 0.0  ;;  %vm128_vm4 = vmxor %vm124_vm1, %vm120_vm0  ;;  %v69_v18 = vmax.f32 %v392_v1, 0.0 }
  0x11   :  { %v72_v19 = vmul.f32 %v402_v12, %v390_v0  ;;  %vm129_vm5 = vmxor %vm125_vm3, %vm121_vm2  ;;  %v73_v33 = vmul.f32 %v404_v13, %v392_v1  ;;  %v367_v0 = vmov 0.25  }
  0x12   :  { %v60_v6 = vmul.f32 1.442695, %v56_v4  ;;  %v62_v7 = vmul.f32 1.442695, %v57_v5  ;;  %vm420_vm8 = vmxor %vm128_vm4, %vm366_vm7  ;;  %v204_v1 = vsel %vm120_vm0, 0.75, %v367_v0  ;;  %v205_v4 = vsel %vm121_vm2, 0.75, %v367_v0 }
  0x13   :  { %vm424_vm10 = vmxor %vm129_vm5, %vm366_vm7  ;;  %v76_v56 = vsub.f32 %v68_v16, %v72_v19  ;;  %v77_v59 = vsub.f32 %v69_v18, %v73_v33 }
  0x14   :  { %272 = vpow2.f32 %v60_v6 }
  0x15   :  { %274 = vpow2.f32 %v62_v7 }
  0x1a   :  { %v396_v8 = vpop.eup %272 }
  0x1b   :  { %v398_v9 = vpop.eup %274  ;;  %v80_v10 = vadd.f32 1.0, %v396_v8  ;;  %v83_v14 = vmul.f32 -0.5, %v396_v8  ;;  %v86_v34 = vand.u32 2147483647, %v396_v8  ;;  %v136_v39 = vsel %vm420_vm8, 1.0, %v396_v8 }
  0x1c   :  { %v89_v11 = vadd.f32 1.0, %v398_v9  ;;  %v92_v20 = vmul.f32 -0.5, %v398_v9  ;;  %v95_v38 = vand.u32 2147483647, %v398_v9  ;;  %v137_v43 = vsel %vm424_vm10, 1.0, %v398_v9 }
  0x1d   :  { %276 = vrcp.f32 %v80_v10  ;;  %v84_v22 = vadd.f32 1.0, %v83_v14  ;;  %vm149_vm6 = vweird.f32 %v80_v10  ;;  %v155_v23 = vand.u32 2147483648, %v80_v10 }
  0x1e   :  { %278 = vrcp.f32 %v89_v11  ;;  %v153_v27 = vand.u32 2147483647, %v80_v10  ;;  %v169_v28 = vand.u32 2147483648, %v89_v11  ;;  %vm163_vm11 = vweird.f32 %v89_v11 }
  0x1f   :  { %280 = vlog2.f32 %v80_v10  ;;  %v167_v31 = vand.u32 2147483647, %v89_v11  ;;  %v93_v35 = vadd.f32 1.0, %v92_v20  ;;  %v156_v41 = vor.u32 1.1754944e-38, %v155_v23 }
  0x20   :  { %282 = vlog2.f32 %v89_v11  ;;  %vm154_vm14 = vcmp.eq.f32.partialorder %v153_v27, 8.507059e+37  ;;  %v170_v45 = vor.u32 1.1754944e-38, %v169_v28  ;;  %v85_v47 = vmul.f32 %v396_v8, %v84_v22 }
  0x21   :  { %vm168_vm1 = vcmp.eq.f32.partialorder %v167_v31, 8.507059e+37  ;;  %vm447_vm3 = vcmp.lt.f32.partialorder %v86_v34, 0.0004427343  ;;  %v94_v51 = vmul.f32 %v398_v9, %v93_v35  ;;  %vm454_vm4 = vcmp.lt.f32.partialorder %v95_v38, 0.0004427343 }
  0x23   :  { %v277_v15 = vpop.eup %276 }
  0x24   :  { %v279_v17 = vpop.eup %278  ;;  %v145_v21 = vmul.f32 %v277_v15, %v80_v10  ;;  %vm150_vm9 = vweird.f32 %v277_v15 }
  0x25   :  { %v159_v24 = vmul.f32 %v279_v17, %v89_v11  ;;  %vm164_vm12 = vweird.f32 %v279_v17  ;;  %v281_v32 = vpop.eup %280  ;;  %vm437_vm13 = vmor %vm149_vm6, %vm150_vm9 }
  0x26   :  { %v146_v26 = vsub.f32 1.0, %v145_v21  ;;  %v283_v37 = vpop.eup %282  ;;  %vm165_vm15 = vmor %vm163_vm11, %vm164_vm12  ;;  %v82_v46 = vmul.f32 0.6931472, %v281_v32 }
  0x27   :  { %v160_v30 = vsub.f32 1.0, %v159_v24  ;;  %v91_v50 = vmul.f32 0.6931472, %v283_v37 }
  0x28   :  { %v147_v36 = vmul.f32 %v277_v15, %v146_v26  ;;  %v88_v60 = vsel %vm447_vm3, %v85_v47, %v82_v46 }
  0x29   :  { %v161_v42 = vmul.f32 %v279_v17, %v160_v30  ;;  %v97_v62 = vsel %vm454_vm4, %v94_v51, %v91_v50  ;;  %v116_v3 = vadd.f32 %v88_v60, %v76_v56 }
  0x2a   :  { %v148_v44 = vadd.f32 %v277_v15, %v147_v36  ;;  %v117_v6 = vadd.f32 %v97_v62, %v77_v59 }
  0x2b   :  { %v162_v48 = vadd.f32 %v279_v17, %v161_v42 }
  0x2c   :  { %v152_v52 = vsel %vm437_vm13, %v277_v15, %v148_v44 }
  0x2d   :  { %v157_v54 = vsel %vm154_vm14, %v156_v41, %v152_v52  ;;  %v166_v55 = vsel %vm165_vm15, %v279_v17, %v162_v48 }
  0x2e   :  { %v171_v57 = vsel %vm168_vm1, %v170_v45, %v166_v55  ;;  %v200_v58 = vmul.f32 %v157_v54, %v136_v39 }
  0x2f   :  { %v201_v61 = vmul.f32 %v171_v57, %v137_v43 }
  0x30   :  { %v208_v63 = vsub.f32 1.0, %v200_v58 }
  0x31   :  { %v209_v2 = vsub.f32 1.0, %v201_v61 }
  0x32   :  { %v212_v5 = vmul.f32 %v208_v63, %v208_v63 }
  0x33   :  { %v213_v7 = vmul.f32 %v209_v2, %v209_v2 }
  0x34   :  { %v216_v8 = vmul.f32 %v212_v5, %v204_v1 }
  0x35   :  { %v217_v9 = vmul.f32 %v213_v7, %v205_v4 }
  0x36   :  { %v220_v10 = vmul.f32 %v216_v8, %v116_v3 }
  0x37   :  { %v221_v11 = vmul.f32 %v217_v9, %v117_v6 }
  0x39   :  { %v243_v12 = vadd.f32 %v221_v11, %v220_v10 }
  0x3b   :  { %246 = vst [vmem:[#allocation7] sm:$0xff] %v243_v12 }
  0x3c   :  { %257 = dma.vmem_to_hbm [thread:$0]  %s253_s1, 128, %s255_s23, [#allocation4]  }
  0x3d   :  { %360 = dma.done.wait [#allocation4], 128  }
  0x3e   :  { %361 = vsyncadd [#allocation4], 4294967168 }
  0x3f   :  { %262 = vsyncpa [#allocation3], 1 }
  0x40   :  { %263 = vsyncpa [#allocation6], 1 }
  0x41   :  { %264 = vsyncpa [#allocation4], 1 }

</bundles_post_ra>
